<compile_context>
chip_gen: v6e
topology: v6e:2x2x1
jax: 0.10.0
libtpu: 0.0.40
codegen_flags: <defaults>
</compile_context>

<pallas_src>
import jax
import jax.numpy as jnp
from jax.experimental import pallas as pl
from jax.experimental.pallas import tpu as pltpu

EMBED_DIM = 32
HIDDEN = 32
LN_EPS = 1e-5
NEG_SLOPE = 0.2

PACK = 4                       # tokens packed per 128-lane row
LANES = PACK * EMBED_DIM       # 128
TM_MAX = 2048                  # packed rows per tile (= 8192 tokens); (TM,128) f32 tile = 1 MiB,
                               # double-buffered in+out ~4 MiB -> fits v5e/v6e/v7x scoped VMEM.


def _leaky_relu(x, slope):
    return jnp.where(x > 0, x, slope * x)


def _round_up(n, m):
    return ((n + m - 1) // m) * m


def fco_kernel(x_ref, gamma_ref, beta_ref, avg_ref, w1_ref, b1_ref, w2_ref, b2_ref, o_ref):
    x = x_ref[...].astype(jnp.float32)
    avg = avg_ref[...]

    # Fused LayerNorm statistics over each 32-lane group (one pass over x):
    # the block-diagonal averaging matmul computes the per-group mean / E[x^2]
    # already broadcast back to all lanes of the group (MXU, lane-dense, no XLU).
    mean = jnp.dot(x, avg, preferred_element_type=jnp.float32)
    ex2 = jnp.dot(x * x, avg, preferred_element_type=jnp.float32)
    var = jnp.maximum(ex2 - mean * mean, 0.0)
    xn = (x - mean) * jax.lax.rsqrt(var + LN_EPS)
    xn = xn * gamma_ref[...] + beta_ref[...]

    # Linear(E, 32) + LeakyReLU(0.2).  Block-diagonal bf16 weights, f32 accumulation.
    # (Dropout = identity in eval mode.)
    h = jnp.dot(xn.astype(jnp.bfloat16), w1_ref[...],
                preferred_element_type=jnp.float32) + b1_ref[...]
    h = _leaky_relu(h, NEG_SLOPE)

    # Linear(32, E) + LeakyReLU(0.2).  (Dropout = identity in eval mode.)
    out = jnp.dot(h.astype(jnp.bfloat16), w2_ref[...],
                  preferred_element_type=jnp.float32) + b2_ref[...]
    out = _leaky_relu(out, NEG_SLOPE)

    o_ref[...] = out.astype(o_ref.dtype)


def fully_connected_output(x, gamma, beta, w1, b1, w2, b2):
    """x: (B, S, E). Returns (B, S, E)."""
    B, S, E = x.shape
    assert E == EMBED_DIM and w1.shape == (EMBED_DIM, HIDDEN) and w2.shape == (HIDDEN, EMBED_DIM)
    N = B * S

    # ---- lane-dense packing: 4 embed-32 vectors per 128-lane row (pad ragged tail) ----
    NP = pl.cdiv(N, PACK)                      # packed rows actually needed
    TM = min(TM_MAX, _round_up(NP, 8))         # row tile (multiple of 8 sublanes)
    NP_pad = _round_up(NP, TM)
    N_pad = NP_pad * PACK
    x2d = x.reshape(N, E)
    if N_pad != N:
        x2d = jnp.pad(x2d, ((0, N_pad - N), (0, 0)))
    xp = x2d.reshape(NP_pad, LANES)

    # ---- packed parameters (block-diagonal / lane-tiled), built once per call ----
    eye4 = jnp.eye(PACK, dtype=jnp.float32)
    avg = jnp.kron(eye4, jnp.full((E, E), 1.0 / E, jnp.float32))      # (128,128) group-mean matrix
    w1p = jnp.kron(eye4, w1.astype(jnp.float32)).astype(jnp.bfloat16)  # (128,128)
    w2p = jnp.kron(eye4, w2.astype(jnp.float32)).astype(jnp.bfloat16)  # (128,128)
    gammap = jnp.tile(gamma.astype(jnp.float32), PACK).reshape(1, LANES)
    betap = jnp.tile(beta.astype(jnp.float32), PACK).reshape(1, LANES)
    b1p = jnp.tile(b1.astype(jnp.float32), PACK).reshape(1, LANES)
    b2p = jnp.tile(b2.astype(jnp.float32), PACK).reshape(1, LANES)

    grid = (NP_pad // TM,)
    row_spec = pl.BlockSpec((TM, LANES), lambda i: (i, 0))
    vec_spec = pl.BlockSpec((1, LANES), lambda i: (0, 0))       # resident across the grid
    mat_spec = pl.BlockSpec((LANES, LANES), lambda i: (0, 0))   # resident across the grid

    out_p = pl.pallas_call(
        fco_kernel,
        out_shape=jax.ShapeDtypeStruct((NP_pad, LANES), x.dtype),
        grid=grid,
        in_specs=[row_spec,            # xp
                  vec_spec, vec_spec,  # gamma, beta
                  mat_spec,            # averaging matrix
                  mat_spec, vec_spec,  # w1, b1
                  mat_spec, vec_spec], # w2, b2
        out_specs=row_spec,
        compiler_params=pltpu.CompilerParams(
            dimension_semantics=("parallel",)),   # megacore sharding on v7x; harmless elsewhere
    )(xp, gammap, betap, avg, w1p, b1p, w2p, b2p)

    out2d = out_p.reshape(N_pad, E)[:N]
    return out2d.reshape(B, S, E)


def init_params(key, embed_dim):
    """Deterministic init mirroring PyTorch defaults (uniform +/- 1/sqrt(fan_in))."""
    k1, k2, k3, k4 = jax.random.split(key, 4)
    bound1 = 1.0 / jnp.sqrt(embed_dim)
    bound2 = 1.0 / jnp.sqrt(HIDDEN)
    # Stored already transposed: (in, out) for row-major matmul in the kernel.
    w1 = jax.random.uniform(k1, (embed_dim, HIDDEN), jnp.float32, -bound1, bound1)
    b1 = jax.random.uniform(k2, (HIDDEN,), jnp.float32, -bound1, bound1)
    w2 = jax.random.uniform(k3, (HIDDEN, embed_dim), jnp.float32, -bound2, bound2)
    b2 = jax.random.uniform(k4, (embed_dim,), jnp.float32, -bound2, bound2)
    gamma = jnp.ones((embed_dim,), jnp.float32)
    beta = jnp.zeros((embed_dim,), jnp.float32)
    return gamma, beta, w1, b1, w2, b2


def _layernorm(x, gamma, beta):
    mean = jnp.mean(x, axis=-1, keepdims=True)
    var = jnp.mean((x - mean) ** 2, axis=-1, keepdims=True)
    return (x - mean) * jax.lax.rsqrt(var + LN_EPS) * gamma + beta


def reference_f32(x, gamma, beta, w1, b1, w2, b2):
    """Pure f32 reference (matches the PyTorch module in eval mode)."""
    xn = _layernorm(x, gamma, beta)
    h = _leaky_relu(xn @ w1 + b1, NEG_SLOPE)
    return _leaky_relu(h @ w2 + b2, NEG_SLOPE)


def reference_mixed(x, gamma, beta, w1, b1, w2, b2):
    """Reference with the kernel's mixed precision (bf16 matmul operands, f32 accum/LN)."""
    xn = _layernorm(x, gamma, beta)
    h = jnp.dot(xn.astype(jnp.bfloat16), w1.astype(jnp.bfloat16),
                preferred_element_type=jnp.float32) + b1
    h = _leaky_relu(h, NEG_SLOPE)
    out = jnp.dot(h.astype(jnp.bfloat16), w2.astype(jnp.bfloat16),
                  preferred_element_type=jnp.float32) + b2
    return _leaky_relu(out, NEG_SLOPE)


if __name__ == "__main__":
    key = jax.random.PRNGKey(0)
    kx, kp = jax.random.split(key)
    B, S, E = 2, 8, EMBED_DIM
    x = jax.random.normal(kx, (B, S, E), jnp.float32)
    params = init_params(kp, E)

    out = jax.block_until_ready(fully_connected_output(x, *params))
    assert out.shape == (B, S, E)

    # Tight check against a reference using the kernel's mixed precision,
    # plus a sanity check against the pure-f32 module semantics.
    assert jnp.allclose(out, reference_mixed(x, *params), atol=2e-2, rtol=2e-2), \
        "mismatch vs mixed-precision reference"
    assert jnp.allclose(out, reference_f32(x, *params), atol=1e-1, rtol=1e-1), \
        "mismatch vs f32 reference"
    print("KERNEL_OK")
</pallas_src>

<mosaic_0001>
module attributes {stable_mosaic.version = 11 : i64} {
  func.func @fco_kernel(%arg0: i32, %arg1: memref<8x128xf32, #tpu.memory_space<vmem>>, %arg2: memref<1x128xf32, #tpu.memory_space<vmem>>, %arg3: memref<1x128xf32, #tpu.memory_space<vmem>>, %arg4: memref<128x128xf32, #tpu.memory_space<vmem>>, %arg5: memref<128x128xbf16, #tpu.memory_space<vmem>>, %arg6: memref<1x128xf32, #tpu.memory_space<vmem>>, %arg7: memref<128x128xbf16, #tpu.memory_space<vmem>>, %arg8: memref<1x128xf32, #tpu.memory_space<vmem>>, %arg9: memref<8x128xf32, #tpu.memory_space<vmem>>) attributes {dimension_semantics = [#tpu.dimension_semantics<parallel>], iteration_bounds = array<i64: 1>, scalar_prefetch = 0 : i64, scratch_operands = 0 : i64, tpu.core_type = #tpu.core_type<tc>, window_params = [{transform_indices = @transform_0, window_bounds = array<i64: 8, 128>}, {pipeline_mode = #tpu.pipeline_mode<synchronous>, transform_indices = @transform_1, window_bounds = array<i64: 1, 128>}, {pipeline_mode = #tpu.pipeline_mode<synchronous>, transform_indices = @transform_2, window_bounds = array<i64: 1, 128>}, {pipeline_mode = #tpu.pipeline_mode<synchronous>, transform_indices = @transform_3, window_bounds = array<i64: 128, 128>}, {pipeline_mode = #tpu.pipeline_mode<synchronous>, transform_indices = @transform_4, window_bounds = array<i64: 128, 128>}, {pipeline_mode = #tpu.pipeline_mode<synchronous>, transform_indices = @transform_5, window_bounds = array<i64: 1, 128>}, {pipeline_mode = #tpu.pipeline_mode<synchronous>, transform_indices = @transform_6, window_bounds = array<i64: 128, 128>}, {pipeline_mode = #tpu.pipeline_mode<synchronous>, transform_indices = @transform_7, window_bounds = array<i64: 1, 128>}, {transform_indices = @transform_8, window_bounds = array<i64: 8, 128>}]} {
    %c0 = arith.constant 0 : index
    %c0_0 = arith.constant 0 : index
    %0 = vector.load %arg1[%c0, %c0_0] : memref<8x128xf32, #tpu.memory_space<vmem>>, vector<8x128xf32>
    %c0_1 = arith.constant 0 : index
    %c0_2 = arith.constant 0 : index
    %1 = vector.load %arg4[%c0_1, %c0_2] : memref<128x128xf32, #tpu.memory_space<vmem>>, vector<128x128xf32>
    %cst = arith.constant dense<0.000000e+00> : vector<8x128xf32>
    %2 = tpu.matmul %0, %1, %cst {dimension_numbers = #tpu.dot_dimension_numbers<[1], [0], [0], [1], [0, 0, 1, 1], [], []>} : vector<8x128xf32>, vector<128x128xf32>, vector<8x128xf32> -> vector<8x128xf32>
    %3 = arith.mulf %0, %0 : vector<8x128xf32>
    %cst_3 = arith.constant dense<0.000000e+00> : vector<8x128xf32>
    %4 = tpu.matmul %3, %1, %cst_3 {dimension_numbers = #tpu.dot_dimension_numbers<[1], [0], [0], [1], [0, 0, 1, 1], [], []>} : vector<8x128xf32>, vector<128x128xf32>, vector<8x128xf32> -> vector<8x128xf32>
    %5 = arith.mulf %2, %2 : vector<8x128xf32>
    %6 = arith.subf %4, %5 : vector<8x128xf32>
    %cst_4 = arith.constant 0.000000e+00 : f32
    %7 = vector.broadcast %cst_4 : f32 to vector<8x128xf32>
    %8 = arith.maximumf %6, %7 : vector<8x128xf32>
    %9 = arith.subf %0, %2 : vector<8x128xf32>
    %cst_5 = arith.constant 9.99999974E-6 : f32
    %10 = vector.broadcast %cst_5 : f32 to vector<8x128xf32>
    %11 = arith.addf %8, %10 : vector<8x128xf32>
    %12 = math.rsqrt %11 : vector<8x128xf32>
    %13 = arith.mulf %9, %12 : vector<8x128xf32>
    %c0_6 = arith.constant 0 : index
    %c0_7 = arith.constant 0 : index
    %14 = vector.load %arg2[%c0_6, %c0_7] : memref<1x128xf32, #tpu.memory_space<vmem>>, vector<1x128xf32>
    %15 = vector.broadcast %14 : vector<1x128xf32> to vector<8x128xf32>
    %16 = arith.mulf %13, %15 : vector<8x128xf32>
    %c0_8 = arith.constant 0 : index
    %c0_9 = arith.constant 0 : index
    %17 = vector.load %arg3[%c0_8, %c0_9] : memref<1x128xf32, #tpu.memory_space<vmem>>, vector<1x128xf32>
    %18 = vector.broadcast %17 : vector<1x128xf32> to vector<8x128xf32>
    %19 = arith.addf %16, %18 : vector<8x128xf32>
    %20 = arith.truncf %19 : vector<8x128xf32> to vector<8x128xbf16>
    %c0_10 = arith.constant 0 : index
    %c0_11 = arith.constant 0 : index
    %21 = vector.load %arg5[%c0_10, %c0_11] : memref<128x128xbf16, #tpu.memory_space<vmem>>, vector<128x128xbf16>
    %cst_12 = arith.constant dense<0.000000e+00> : vector<8x128xf32>
    %22 = tpu.matmul %20, %21, %cst_12 {dimension_numbers = #tpu.dot_dimension_numbers<[1], [0], [0], [1], [0, 0, 1, 1], [], []>} : vector<8x128xbf16>, vector<128x128xbf16>, vector<8x128xf32> -> vector<8x128xf32>
    %c0_13 = arith.constant 0 : index
    %c0_14 = arith.constant 0 : index
    %23 = vector.load %arg6[%c0_13, %c0_14] : memref<1x128xf32, #tpu.memory_space<vmem>>, vector<1x128xf32>
    %24 = vector.broadcast %23 : vector<1x128xf32> to vector<8x128xf32>
    %25 = arith.addf %22, %24 : vector<8x128xf32>
    %cst_15 = arith.constant 0.000000e+00 : f32
    %26 = vector.broadcast %cst_15 : f32 to vector<8x128xf32>
    %27 = arith.cmpf ogt, %25, %26 : vector<8x128xf32>
    %cst_16 = arith.constant 2.000000e-01 : f32
    %28 = vector.broadcast %cst_16 : f32 to vector<8x128xf32>
    %29 = arith.mulf %28, %25 : vector<8x128xf32>
    %30 = arith.select %27, %25, %29 : vector<8x128xi1>, vector<8x128xf32>
    %31 = arith.truncf %30 : vector<8x128xf32> to vector<8x128xbf16>
    %c0_17 = arith.constant 0 : index
    %c0_18 = arith.constant 0 : index
    %32 = vector.load %arg7[%c0_17, %c0_18] : memref<128x128xbf16, #tpu.memory_space<vmem>>, vector<128x128xbf16>
    %cst_19 = arith.constant dense<0.000000e+00> : vector<8x128xf32>
    %33 = tpu.matmul %31, %32, %cst_19 {dimension_numbers = #tpu.dot_dimension_numbers<[1], [0], [0], [1], [0, 0, 1, 1], [], []>} : vector<8x128xbf16>, vector<128x128xbf16>, vector<8x128xf32> -> vector<8x128xf32>
    %c0_20 = arith.constant 0 : index
    %c0_21 = arith.constant 0 : index
    %34 = vector.load %arg8[%c0_20, %c0_21] : memref<1x128xf32, #tpu.memory_space<vmem>>, vector<1x128xf32>
    %35 = vector.broadcast %34 : vector<1x128xf32> to vector<8x128xf32>
    %36 = arith.addf %33, %35 : vector<8x128xf32>
    %cst_22 = arith.constant 0.000000e+00 : f32
    %37 = vector.broadcast %cst_22 : f32 to vector<8x128xf32>
    %38 = arith.cmpf ogt, %36, %37 : vector<8x128xf32>
    %cst_23 = arith.constant 2.000000e-01 : f32
    %39 = vector.broadcast %cst_23 : f32 to vector<8x128xf32>
    %40 = arith.mulf %39, %36 : vector<8x128xf32>
    %41 = arith.select %38, %36, %40 : vector<8x128xi1>, vector<8x128xf32>
    %c0_24 = arith.constant 0 : index
    %c0_25 = arith.constant 0 : index
    %42 = vector.load %arg9[%c0_24, %c0_25] : memref<8x128xf32, #tpu.memory_space<vmem>>, vector<8x128xf32>
    tpu.vector_store %arg9[%c0_24, %c0_25], %41 {strides = array<i32>} : memref<8x128xf32, #tpu.memory_space<vmem>>, vector<8x128xf32>,
    return
  }
  func.func @transform_0(%arg0: i32) -> (i32, i32) {
    %c0_i32 = arith.constant 0 : i32
    %c0_i32_0 = arith.constant 0 : i32
    return %arg0, %c0_i32 : i32, i32
  }
  func.func @transform_1(%arg0: i32) -> (i32, i32) {
    %c0_i32 = arith.constant 0 : i32
    %c0_i32_0 = arith.constant 0 : i32
    %c0_i32_1 = arith.constant 0 : i32
    return %c0_i32, %c0_i32_0 : i32, i32
  }
  func.func @transform_2(%arg0: i32) -> (i32, i32) {
    %c0_i32 = arith.constant 0 : i32
    %c0_i32_0 = arith.constant 0 : i32
    %c0_i32_1 = arith.constant 0 : i32
    return %c0_i32, %c0_i32_0 : i32, i32
  }
  func.func @transform_3(%arg0: i32) -> (i32, i32) {
    %c0_i32 = arith.constant 0 : i32
    %c0_i32_0 = arith.constant 0 : i32
    %c0_i32_1 = arith.constant 0 : i32
    return %c0_i32, %c0_i32_0 : i32, i32
  }
  func.func @transform_4(%arg0: i32) -> (i32, i32) {
    %c0_i32 = arith.constant 0 : i32
    %c0_i32_0 = arith.constant 0 : i32
    %c0_i32_1 = arith.constant 0 : i32
    return %c0_i32, %c0_i32_0 : i32, i32
  }
  func.func @transform_5(%arg0: i32) -> (i32, i32) {
    %c0_i32 = arith.constant 0 : i32
    %c0_i32_0 = arith.constant 0 : i32
    %c0_i32_1 = arith.constant 0 : i32
    return %c0_i32, %c0_i32_0 : i32, i32
  }
  func.func @transform_6(%arg0: i32) -> (i32, i32) {
    %c0_i32 = arith.constant 0 : i32
    %c0_i32_0 = arith.constant 0 : i32
    %c0_i32_1 = arith.constant 0 : i32
    return %c0_i32, %c0_i32_0 : i32, i32
  }
  func.func @transform_7(%arg0: i32) -> (i32, i32) {
    %c0_i32 = arith.constant 0 : i32
    %c0_i32_0 = arith.constant 0 : i32
    %c0_i32_1 = arith.constant 0 : i32
    return %c0_i32, %c0_i32_0 : i32, i32
  }
  func.func @transform_8(%arg0: i32) -> (i32, i32) {
    %c0_i32 = arith.constant 0 : i32
    %c0_i32_0 = arith.constant 0 : i32
    return %arg0, %c0_i32 : i32, i32
  }
}

</mosaic_0001>

<bundles_post_ra>
// kernel: tpu_custom_call.1
= control target key start
LH: loop header
LB: loop body
LE: loop exit
PB: predicated region body
PF: predicated region fallthrough
CT: control target
= control target key end

     0   :  { %13 = vsyncpa [#allocation3], 0  ;;  %s977_s0 = inlined_call_operand.hbm [shape: f32[8,128], index: 0, kind: input, shape index: {}]   ;;  %s978_s1 = inlined_call_operand.vmem [shape: f32[1,128], index: 1, kind: input, shape index: {}]   ;;  %s979_s2 = inlined_call_operand.vmem [shape: f32[1,128], index: 2, kind: input, shape index: {}]   ;;  %s980_s3 = inlined_call_operand.hbm [shape: f32[128,128], index: 3, kind: input, shape index: {}]   ;;  %s981_s4 = inlined_call_operand.hbm [shape: bf16[128,128], index: 4, kind: input, shape index: {}]   ;;  %s982_s5 = inlined_call_operand.vmem [shape: f32[1,128], index: 5, kind: input, shape index: {}]   ;;  %s983_s6 = inlined_call_operand.hbm [shape: bf16[128,128], index: 6, kind: input, shape index: {}]   ;;  %s984_s7 = inlined_call_operand.vmem [shape: f32[1,128], index: 7, kind: input, shape index: {}]   ;;  %s985_s8 = inlined_call_operand.hbm [shape: f32[8,128], index: 8, kind: output, shape index: {}]  }
   0x1   :  { %14 = vsyncpa [#allocation6], 0 }
   0x2   :  { %15 = vsyncpa [#allocation9], 0 }
   0x3   :  { %16 = vsyncpa [#allocation4], 0  ;;  %s832_s27 = smov [#allocation5]  }
   0x4   :  { %s36_s28 = sshll.u32 %s832_s27, 4  ;;  %s37_s28 = int_to_ptr.vmem [resolvable:$true] %s36_s28 }
   0x5   :  { %s732_s29 = scalar_lea.vmem %s37_s28, 2048  ;;  %p737_p1 = scmp.lt.s32.totalorder %s37_s28, %s37_s28 }
   0x6   :  { %p733_p0 = scmp.ne.s32.totalorder %s37_s28, %s732_s29  ;;  %p738_p2 = scmp.lt.s32.totalorder %s732_s29, %s732_s29 }
   0x8   :  { %p739_p3 = por %p738_p2, %p737_p1 }
   0xa   :  { %p740_p4 = pnand %p739_p3, %p733_p0 }
   0xc   :  { %743 = shalt.err (!%p740_p4)
}
   0xd   :  { %s833_s30 = smov 128   ;;  %s834_s9 = smov 8  }
   0xe   :  { %42 = dma.hbm_to_vmem [thread:$0]  %s980_s3, 2048, %s37_s28, [#allocation6], %s833_s30, %s833_s30, %s834_s9  }
   0xf   :  { %s835_s12 = smov [#allocation2]   ;;  %s836_s14 = smov [#allocation7]  }
  0x10   :  { %s23_s13 = sshll.u32 %s835_s12, 4  ;;  %s48_s15 = sshll.u32 %s836_s14, 4  ;;  %s24_s13 = int_to_ptr.vmem [resolvable:$true] %s23_s13  ;;  %s49_s15 = int_to_ptr.vmem [resolvable:$true] %s48_s15 }
  0x11   :  { %s752_s16 = scalar_lea.vmem %s24_s13, 128  ;;  %p757_p6 = scmp.lt.s32.totalorder %s24_s13, %s24_s13 }
  0x12   :  { %p753_p5 = scmp.ne.s32.totalorder %s24_s13, %s752_s16  ;;  %p758_p7 = scmp.lt.s32.totalorder %s752_s16, %s752_s16 }
  0x14   :  { %p759_p8 = por %p758_p7, %p757_p6 }
  0x16   :  { %p760_p9 = pnand %p759_p8, %p753_p5 }
  0x18   :  { %763 = shalt.err (!%p760_p9)
}
  0x19   :  { %26 = dma.hbm_to_vmem [thread:$0]  %s977_s0, 128, %s24_s13, [#allocation3]  }
  0x1a   :  { %s772_s19 = scalar_lea.vmem %s49_s15, 1024  ;;  %p777_p11 = scmp.lt.s32.totalorder %s49_s15, %s49_s15 }
  0x1b   :  { %p773_p10 = scmp.ne.s32.totalorder %s49_s15, %s772_s19  ;;  %p778_p12 = scmp.lt.s32.totalorder %s772_s19, %s772_s19 }
  0x1d   :  { %p779_p13 = por %p778_p12, %p777_p11 }
  0x1f   :  { %p780_p0 = pnand %p779_p13, %p773_p10 }
  0x21   :  { %783 = shalt.err (!%p780_p0)
}
  0x22   :  { %s837_s3 = smov 64   ;;  %s838_s20 = smov 4  }
  0x23   :  { %54 = dma.hbm_to_vmem [thread:$0]  %s981_s4, 1024, %s49_s15, [#allocation6], %s837_s3, %s837_s3, %s838_s20  }
  0x24   :  { %s839_s23 = smov [#allocation8]  }
  0x25   :  { %s62_s24 = sshll.u32 %s839_s23, 4  ;;  %s63_s24 = int_to_ptr.vmem [resolvable:$true] %s62_s24 }
  0x26   :  { %s792_s25 = scalar_lea.vmem %s63_s24, 1024  ;;  %p797_p2 = scmp.lt.s32.totalorder %s63_s24, %s63_s24 }
  0x27   :  { %p793_p1 = scmp.ne.s32.totalorder %s63_s24, %s792_s25  ;;  %p798_p3 = scmp.lt.s32.totalorder %s792_s25, %s792_s25 }
  0x29   :  { %p799_p4 = por %p798_p3, %p797_p2 }
  0x2b   :  { %p800_p5 = pnand %p799_p4, %p793_p1 }
  0x2d   :  { %803 = shalt.err (!%p800_p5)
}
  0x2e   :  { %68 = dma.hbm_to_vmem [thread:$0]  %s983_s6, 1024, %s63_s24, [#allocation9], %s837_s3, %s837_s3, %s838_s20  }
  0x2f   :  { %824 = dma.done.wait [#allocation3], 128  }
  0x30   :  { %825 = vsyncadd [#allocation3], 4294967168 }
  0x31   :  { %826 = dma.done.wait [#allocation6], 3072  }
  0x32   :  { %827 = vsyncadd [#allocation6], 4294964224 }
  0x33   :  { %828 = dma.done.wait [#allocation9], 1024  }
  0x34   :  { %829 = vsyncadd [#allocation9], 4294966272  ;;  %v840_v0 = vmov 0.0   ;;  %vm841_vm0 = vmmov 0   ;;  %v100_v1 = vld [vmem:[#allocation5 + $0x78] sm:$0xff]  ;;  %v99_v2 = vld [vmem:[#allocation5 + $0x70] sm:$0xff] }
  0x35   :  { %585 = vmatprep.subr.mxu0 %v840_v0  ;;  %620 = vmatprep.subr.mxu1 %v840_v0  ;;  %v98_v3 = vld [vmem:[#allocation5 + $0x68] sm:$0xff]  ;;  %v97_v4 = vld [vmem:[#allocation5 + $0x60] sm:$0xff]  ;;  %v96_v5 = vld [vmem:[#allocation5 + $0x58] sm:$0xff]  ;;  %s842_s9 = smov [#allocation10]  }
  0x36   :  { %617 = vmatprep.mubr.msk.f32.mxu0 %vm841_vm0, %v840_v0  ;;  %652 = vmatprep.mubr.msk.f32.mxu1 %vm841_vm0, %v840_v0  ;;  %v95_v6 = vld [vmem:[#allocation5 + $0x50] sm:$0xff]  ;;  %v94_v7 = vld [vmem:[#allocation5 + $0x48] sm:$0xff]  ;;  %v93_v8 = vld [vmem:[#allocation5 + $0x40] sm:$0xff]  ;;  %s502_s10 = sshll.u32 %s842_s9, 4  ;;  %s503_s10 = int_to_ptr.vmem [resolvable:$true] %s502_s10 }
  0x37   :  { %586 = vmatpush3.msra.mxu0 %v100_v1  ;;  %621 = vmatpush3.msra.mxu1 %v100_v1  ;;  %v92_v9 = vld [vmem:[#allocation5 + $0x38] sm:$0xff]  ;;  %v91_v10 = vld [vmem:[#allocation5 + $0x30] sm:$0xff]  ;;  %v90_v11 = vld [vmem:[#allocation5 + $0x28] sm:$0xff]  ;;  %p809_p7 = scmp.lt.s32.totalorder %s503_s10, %s503_s10 }
  0x38   :  { %587 = vmatprep.subr.mxu0 %v840_v0  ;;  %622 = vmatprep.subr.mxu1 %v840_v0  ;;  %v89_v12 = vld [vmem:[#allocation5 + $0x20] sm:$0xff]  ;;  %v88_v13 = vld [vmem:[#allocation5 + $0x18] sm:$0xff]  ;;  %v87_v14 = vld [vmem:[#allocation5 + $0x10] sm:$0xff] }
  0x39   :  { %588 = vmatpush3.msra.mxu0 %v99_v2  ;;  %623 = vmatpush3.msra.mxu1 %v99_v2  ;;  %v930_v15 = vld [vmem:[#allocation2] sm:$0xff]  ;;  %v86_v16 = vld [vmem:[#allocation5 + $0x8] sm:$0xff]  ;;  %v85_v17 = vld [vmem:[#allocation5] sm:$0xff] }
  0x3a   :  { %589 = vmatprep.subr.mxu0 %v840_v0  ;;  %624 = vmatprep.subr.mxu1 %v840_v0  ;;  %v171_v18 = vmul.f32 %v930_v15, %v930_v15  ;;  %v706_v19 = vld [vmem:[#allocation7 + $0x38] sm:$0xff]   ;;  %v707_v20 = vld [vmem:[#allocation7 + $0x30] sm:$0xff]   ;;  %v708_v21 = vld [vmem:[#allocation7 + $0x28] sm:$0xff]  }
  0x3b   :  { %590 = vmatpush3.msra.mxu0 %v98_v3  ;;  %625 = vmatpush3.msra.mxu1 %v98_v3  ;;  %v709_v22 = vld [vmem:[#allocation7 + $0x20] sm:$0xff]   ;;  %v710_v23 = vld [vmem:[#allocation7 + $0x18] sm:$0xff]   ;;  %v711_v24 = vld [vmem:[#allocation7 + $0x10] sm:$0xff]  }
  0x3c   :  { %591 = vmatprep.subr.mxu0 %v840_v0  ;;  %626 = vmatprep.subr.mxu1 %v840_v0  ;;  %v712_v25 = vld [vmem:[#allocation7 + $0x8] sm:$0xff]   ;;  %v713_v26 = vld [vmem:[#allocation7] sm:$0xff]   ;;  %v714_v27 = vld [vmem:[#allocation8 + $0x38] sm:$0xff]  }
  0x3d   :  { %592 = vmatpush3.msra.mxu0 %v97_v4  ;;  %627 = vmatpush3.msra.mxu1 %v97_v4  ;;  %v715_v28 = vld [vmem:[#allocation8 + $0x30] sm:$0xff]   ;;  %v716_v29 = vld [vmem:[#allocation8 + $0x28] sm:$0xff]   ;;  %v717_v30 = vld [vmem:[#allocation8 + $0x20] sm:$0xff]  }
  0x3e   :  { %593 = vmatprep.subr.mxu0 %v840_v0  ;;  %628 = vmatprep.subr.mxu1 %v840_v0  ;;  %v718_v31 = vld [vmem:[#allocation8 + $0x18] sm:$0xff]   ;;  %v719_v32 = vld [vmem:[#allocation8 + $0x10] sm:$0xff]   ;;  %v720_v49 = vld [vmem:[#allocation8 + $0x8] sm:$0xff]  }
  0x3f   :  { %594 = vmatpush3.msra.mxu0 %v96_v5  ;;  %629 = vmatpush3.msra.mxu1 %v96_v5  ;;  %v513_v43 = vld [vmem:[%s978_s1] ss:$0 sm:$0xff]  ;;  %v721_v50 = vld [vmem:[#allocation8] sm:$0xff]  }
  0x40   :  { %595 = vmatprep.subr.mxu0 %v840_v0  ;;  %630 = vmatprep.subr.mxu1 %v840_v0  ;;  %v514_v45 = vld [vmem:[%s979_s2] ss:$0 sm:$0xff] }
  0x41   :  { %596 = vmatpush3.msra.mxu0 %v95_v6  ;;  %631 = vmatpush3.msra.mxu1 %v95_v6  ;;  %v515_v51 = vld [vmem:[%s982_s5] ss:$0 sm:$0xff]  ;;  %s804_s5 = scalar_lea.vmem %s503_s10, 128 }
  0x42   :  { %597 = vmatprep.subr.mxu0 %v840_v0  ;;  %632 = vmatprep.subr.mxu1 %v840_v0  ;;  %v524_v60 = vld [vmem:[%s984_s7] ss:$0 sm:$0xff]  ;;  %p805_p6 = scmp.ne.s32.totalorder %s503_s10, %s804_s5  ;;  %p810_p8 = scmp.lt.s32.totalorder %s804_s5, %s804_s5 }
  0x43   :  { %598 = vmatpush3.msra.mxu0 %v94_v7  ;;  %633 = vmatpush3.msra.mxu1 %v94_v7 }
  0x44   :  { %599 = vmatprep.subr.mxu0 %v840_v0  ;;  %634 = vmatprep.subr.mxu1 %v840_v0  ;;  %p811_p9 = por %p810_p8, %p809_p7 }
  0x45   :  { %600 = vmatpush3.msra.mxu0 %v93_v8  ;;  %635 = vmatpush3.msra.mxu1 %v93_v8 }
  0x46   :  { %601 = vmatprep.subr.mxu0 %v840_v0  ;;  %636 = vmatprep.subr.mxu1 %v840_v0  ;;  %p812_p10 = pnand %p811_p9, %p805_p6 }
  0x47   :  { %602 = vmatpush3.msra.mxu0 %v92_v9  ;;  %637 = vmatpush3.msra.mxu1 %v92_v9 }
  0x48   :  { %603 = vmatprep.subr.mxu0 %v840_v0  ;;  %638 = vmatprep.subr.mxu1 %v840_v0 }
  0x49   :  { %604 = vmatpush3.msra.mxu0 %v91_v10  ;;  %639 = vmatpush3.msra.mxu1 %v91_v10 }
  0x4a   :  { %605 = vmatprep.subr.mxu0 %v840_v0  ;;  %640 = vmatprep.subr.mxu1 %v840_v0 }
  0x4b   :  { %606 = vmatpush3.msra.mxu0 %v90_v11  ;;  %641 = vmatpush3.msra.mxu1 %v90_v11 }
  0x4c   :  { %607 = vmatprep.subr.mxu0 %v840_v0  ;;  %642 = vmatprep.subr.mxu1 %v840_v0 }
  0x4d   :  { %608 = vmatpush3.msra.mxu0 %v89_v12  ;;  %643 = vmatpush3.msra.mxu1 %v89_v12 }
  0x4e   :  { %609 = vmatprep.subr.mxu0 %v840_v0  ;;  %644 = vmatprep.subr.mxu1 %v840_v0 }
  0x4f   :  { %610 = vmatpush3.msra.mxu0 %v88_v13  ;;  %645 = vmatpush3.msra.mxu1 %v88_v13 }
  0x50   :  { %611 = vmatprep.subr.mxu0 %v840_v0  ;;  %646 = vmatprep.subr.mxu1 %v840_v0 }
  0x51   :  { %612 = vmatpush3.msra.mxu0 %v87_v14  ;;  %647 = vmatpush3.msra.mxu1 %v87_v14 }
  0x52   :  { %613 = vmatprep.subr.mxu0 %v840_v0  ;;  %648 = vmatprep.subr.mxu1 %v840_v0 }
  0x53   :  { %614 = vmatpush3.msra.mxu0 %v86_v16  ;;  %649 = vmatpush3.msra.mxu1 %v86_v16 }
  0x54   :  { %615 = vmatprep.subr.mxu0 %v840_v0  ;;  %650 = vmatprep.subr.mxu1 %v840_v0 }
  0x55   :  { %616 = vmatpush3.msra.mxu0 %v85_v17  ;;  %651 = vmatpush3.msra.mxu1 %v85_v17 }
  0x56   :  { %618 = vmatmul.mubr.f32.vlgmr.msra.gmra.mxu0 %v930_v15  ;;  %653 = vmatmul.mubr.f32.vlgmr.msra.gmra.mxu1 %v171_v18 }
  0x57   :  { %655 = vmatprep.subr.bf16.mxu0 %v840_v0  ;;  %671 = vmatprep.mubr.msk.bf16.mxu0 %vm841_vm0, %v840_v0 }
  0x58   :  { %675 = vmatprep.subr.bf16.mxu1 %v840_v0  ;;  %691 = vmatprep.mubr.msk.bf16.mxu1 %vm841_vm0, %v840_v0 }
  0x59   :  { %656 = vmatpush3.bf16.msra.mxu0 %v706_v19  ;;  %676 = vmatpush3.bf16.msra.mxu1 %v714_v27 }
  0x5a   :  { %657 = vmatprep.subr.bf16.mxu0 %v840_v0  ;;  %677 = vmatprep.subr.bf16.mxu1 %v840_v0 }
  0x5d   :  { %658 = vmatpush3.bf16.msra.mxu0 %v707_v20  ;;  %678 = vmatpush3.bf16.msra.mxu1 %v715_v28 }
  0x5e   :  { %659 = vmatprep.subr.bf16.mxu0 %v840_v0  ;;  %679 = vmatprep.subr.bf16.mxu1 %v840_v0 }
  0x61   :  { %660 = vmatpush3.bf16.msra.mxu0 %v708_v21  ;;  %680 = vmatpush3.bf16.msra.mxu1 %v716_v29 }
  0x62   :  { %661 = vmatprep.subr.bf16.mxu0 %v840_v0  ;;  %681 = vmatprep.subr.bf16.mxu1 %v840_v0 }
  0x65   :  { %662 = vmatpush3.bf16.msra.mxu0 %v709_v22  ;;  %682 = vmatpush3.bf16.msra.mxu1 %v717_v30 }
  0x66   :  { %663 = vmatprep.subr.bf16.mxu0 %v840_v0  ;;  %683 = vmatprep.subr.bf16.mxu1 %v840_v0 }
  0x69   :  { %664 = vmatpush3.bf16.msra.mxu0 %v710_v23  ;;  %684 = vmatpush3.bf16.msra.mxu1 %v718_v31 }
  0x6a   :  { %665 = vmatprep.subr.bf16.mxu0 %v840_v0  ;;  %685 = vmatprep.subr.bf16.mxu1 %v840_v0 }
  0x6d   :  { %666 = vmatpush3.bf16.msra.mxu0 %v711_v24  ;;  %686 = vmatpush3.bf16.msra.mxu1 %v719_v32 }
  0x6e   :  { %667 = vmatprep.subr.bf16.mxu0 %v840_v0  ;;  %687 = vmatprep.subr.bf16.mxu1 %v840_v0 }
  0x71   :  { %668 = vmatpush3.bf16.msra.mxu0 %v712_v25  ;;  %688 = vmatpush3.bf16.msra.mxu1 %v720_v49 }
  0x72   :  { %669 = vmatprep.subr.bf16.mxu0 %v840_v0  ;;  %689 = vmatprep.subr.bf16.mxu1 %v840_v0 }
  0x75   :  { %670 = vmatpush3.bf16.msra.mxu0 %v713_v26  ;;  %690 = vmatpush3.bf16.msra.mxu1 %v721_v50 }
 0x116   :  { %v167_v33 = vpop.f32.mrf.mxu0  ;;  %v238_v34 = vpop.f32.mrf.mxu1 }
 0x117   :  { %v242_v35 = vmul.f32 %v167_v33, %v167_v33  ;;  %v245_v41 = vsub.f32 %v930_v15, %v167_v33 }
 0x118   :  { %v619_v36 = vpop.f32.mrf.mxu0  ;;  %v654_v37 = vpop.f32.mrf.mxu1 }
 0x119   :  { %v243_v38 = vsub.f32 %v238_v34, %v242_v35 }
 0x11b   :  { %v244_v39 = vmax.f32 %v243_v38, 0.0 }
 0x11d   :  { %v246_v40 = vadd.f32 1e-05, %v244_v39 }
 0x11f   :  { %722 = vrsqrt.f32 %v246_v40 }
 0x12c   :  { %v723_v42 = vpop.eup %722 }
 0x12d   :  { %v248_v44 = vmul.f32 %v723_v42, %v245_v41 }
 0x12f   :  { %v256_v46 = vmul.f32 %v513_v43, %v248_v44 }
 0x131   :  { %v264_v47 = vadd.f32 %v514_v45, %v256_v46 }
 0x133   :  { %v265_v48 = vpack.c.bf16 %v264_v47, %v264_v47 }
 0x135   :  { %672 = vmatmul.mubr.bf16.vlgmr.msra.gmra.mxu0 %v265_v48 }
 0x1f5   :  { %v371_v52 = vpop.f32.mrf.mxu0 }
 0x1f6   :  { %v372_v53 = vadd.f32 %v515_v51, %v371_v52 }
 0x1f7   :  { %v673_v54 = vpop.f32.mrf.mxu0 }
 0x1f8   :  { %vm377_vm1 = vcmp.gt.f32.partialorder %v372_v53, 0.0  ;;  %v378_v55 = vmul.f32 0.2, %v372_v53 }
 0x1f9   :  { %v374_v56 = vpop.f32.mrf.mxu0 }
 0x1fa   :  { %v379_v57 = vsel %vm377_vm1, %v372_v53, %v378_v55 }
 0x1fb   :  { %v380_v58 = vpack.c.bf16 %v379_v57, %v379_v57  ;;  %v674_v59 = vpop.f32.mrf.mxu0 }
 0x1fd   :  { %692 = vmatmul.mubr.bf16.vlgmr.msra.gmra.mxu1 %v380_v58 }
 0x2bd   :  { %v486_v61 = vpop.f32.mrf.mxu1 }
 0x2be   :  { %v487_v62 = vadd.f32 %v524_v60, %v486_v61 }
 0x2bf   :  { %v693_v63 = vpop.f32.mrf.mxu1 }
 0x2c0   :  { %v493_v0 = vmul.f32 0.2, %v487_v62  ;;  %vm492_vm2 = vcmp.gt.f32.partialorder %v487_v62, 0.0 }
 0x2c1   :  { %v489_v1 = vpop.f32.mrf.mxu1 }
 0x2c2   :  { %v494_v2 = vsel %vm492_vm2, %v487_v62, %v493_v0 }
 0x2c3   :  { %v694_v3 = vpop.f32.mrf.mxu1  ;;  %495 = vst [vmem:[#allocation10] sm:$0xff] %v494_v2 }
 0x2c4   :  { %815 = shalt.err (!%p812_p10)
}
 0x2c5   :  { %505 = dma.vmem_to_hbm [thread:$0]  %s503_s10, 128, %s985_s8, [#allocation4]  }
 0x2c6   :  { %830 = dma.done.wait [#allocation4], 128  }
 0x2c7   :  { %831 = vsyncadd [#allocation4], 4294967168 }
 0x2c8   :  { %509 = vsyncpa [#allocation3], 1 }
 0x2c9   :  { %510 = vsyncpa [#allocation6], 1 }
 0x2ca   :  { %511 = vsyncpa [#allocation9], 1 }
 0x2cb   :  { %512 = vsyncpa [#allocation4], 1 }

</bundles_post_ra>
